<compile_context>
chip_gen: v7x
topology: tpu7x:2x2x1
jax: 0.10.0
libtpu: 0.0.40
codegen_flags: <defaults>
</compile_context>

<pallas_src>
import jax
import jax.numpy as jnp
from jax.experimental import pallas as pl
from jax.experimental.pallas import tpu as pltpu

IN_FEATURES = 400
OUT_FEATURES = 1

# Batch tile: large enough to amortize the ~0.35 us per-grid-step overhead,
# small enough that double-buffered x tiles (2 x TB*400*4B) fit comfortably in
# scoped VMEM on every generation (1024 rows -> 1.6 MiB per buffer).
# Raise to 2048-4096 on v7x to stay near its 3.2 TB/s HBM roofline.
TB_MAX = 1024


def linear_kernel(x_ref, w_ref, b_ref, o_ref):
    # x_ref: (TB, 400) f32 VMEM tile, w_ref: (1, 400) f32 VMEM (resident),
    # b_ref: (1, 1) f32 SMEM, o_ref: (TB, 1) f32 VMEM tile.
    x = x_ref[...]                                   # (TB, 400)
    w = w_ref[...]                                   # (1, 400)
    # VPU multiply + XLU lane reduction instead of an N=1 MXU matmul.
    acc = jnp.sum(x * w, axis=-1, keepdims=True)     # (TB, 1) f32
    o_ref[...] = (acc + b_ref[0, 0]).astype(o_ref.dtype)


def linear_forward(x, w_row, b):
    """x: (B, 400) f32, w_row: (1, 400) f32, b: (1, 1) f32 -> (B, 1) f32."""
    B = x.shape[0]
    # If B fits in one tile, use the full extent (valid even when B % 8 != 0);
    # otherwise tile with TB_MAX (multiple of 8; last partial tile is padded
    # by Pallas and its out-of-range rows are masked on store).
    TB = B if B <= TB_MAX else TB_MAX
    grid = (pl.cdiv(B, TB),)

    cost = pl.CostEstimate(
        flops=2 * B * IN_FEATURES,
        transcendentals=0,
        bytes_accessed=(B * IN_FEATURES * 4          # read x
                        + B * OUT_FEATURES * 4       # write y
                        + IN_FEATURES * 4 + 4),      # read w, b
    )

    return pl.pallas_call(
        linear_kernel,
        out_shape=jax.ShapeDtypeStruct((B, OUT_FEATURES), x.dtype),
        grid_spec=pltpu.PrefetchScalarGridSpec(
            num_scalar_prefetch=0,
            grid=grid,
            in_specs=[
                # x: batch-tiled, pipelined across grid steps.
                pl.BlockSpec((TB, IN_FEATURES), lambda i: (i, 0)),
                # w: constant block -> stays resident in VMEM.
                pl.BlockSpec((1, IN_FEATURES), lambda i: (0, 0)),
                # bias: scalar in SMEM.
                pl.BlockSpec(memory_space=pltpu.MemorySpace.SMEM),
            ],
            out_specs=pl.BlockSpec((TB, OUT_FEATURES), lambda i: (i, 0)),
        ),
        compiler_params=pltpu.CompilerParams(
            # Batch tiles are independent -> shard across TCs on v7x megacore.
            dimension_semantics=("parallel",),
        ),
        cost_estimate=cost,
    )(x, w_row, b)


if __name__ == "__main__":
    key = jax.random.PRNGKey(0)
    kx, kw, kb = jax.random.split(key, 3)

    batch = 8
    # Deterministic parameter init (PyTorch nn.Linear-style uniform bound 1/sqrt(400))
    bound = 1.0 / (IN_FEATURES ** 0.5)
    w = jax.random.uniform(kw, (OUT_FEATURES, IN_FEATURES), jnp.float32, -bound, bound)
    b = jax.random.uniform(kb, (OUT_FEATURES,), jnp.float32, -bound, bound)

    x = jax.random.normal(kx, (batch, IN_FEATURES), jnp.float32)

    # Glue: PyTorch weight is already (out=1, in=400) == the (1, 400) row the
    # kernel wants; bias reshaped to (1, 1) for the SMEM ref.
    w_row = w.reshape(OUT_FEATURES, IN_FEATURES)
    b2 = b.reshape(1, OUT_FEATURES)

    out = linear_forward(x, w_row, b2)
    out = jax.block_until_ready(out)

    # Reference check against plain JAX (same semantics as torch nn.Linear)
    ref = x @ w.T + b
    assert out.shape == (batch, OUT_FEATURES)
    assert jnp.allclose(out, ref, atol=1e-5, rtol=1e-5)

    print("KERNEL_OK")
</pallas_src>

<mosaic_0001>
module attributes {stable_mosaic.version = 11 : i64} {
  func.func @linear_kernel(%arg0: i32, %arg1: memref<8x400xf32, #tpu.memory_space<vmem>>, %arg2: memref<1x400xf32, #tpu.memory_space<vmem>>, %arg3: memref<1x1xf32, #tpu.memory_space<smem>>, %arg4: memref<8x1xf32, #tpu.memory_space<vmem>>) attributes {dimension_semantics = [#tpu.dimension_semantics<parallel>], iteration_bounds = array<i64: 1>, scalar_prefetch = 0 : i64, scratch_operands = 0 : i64, tpu.core_type = #tpu.core_type<tc>, window_params = [{transform_indices = @transform_0, window_bounds = array<i64: 8, 400>}, {pipeline_mode = #tpu.pipeline_mode<synchronous>, transform_indices = @transform_1, window_bounds = array<i64: 1, 400>}, {transform_indices = @transform_2, window_bounds = array<i64: 1, 1>}, {transform_indices = @transform_3, window_bounds = array<i64: 8, 1>}]} {
    %c0 = arith.constant 0 : index
    %c0_0 = arith.constant 0 : index
    %0 = vector.load %arg1[%c0, %c0_0] : memref<8x400xf32, #tpu.memory_space<vmem>>, vector<8x400xf32>
    %c0_1 = arith.constant 0 : index
    %c0_2 = arith.constant 0 : index
    %1 = vector.load %arg2[%c0_1, %c0_2] : memref<1x400xf32, #tpu.memory_space<vmem>>, vector<1x400xf32>
    %2 = vector.broadcast %1 : vector<1x400xf32> to vector<8x400xf32>
    %3 = arith.mulf %0, %2 : vector<8x400xf32>
    %cst = arith.constant dense<0.000000e+00> : vector<8xf32>
    %4 = vector.multi_reduction <add>, %3, %cst [1] : vector<8x400xf32> to vector<8xf32>
    %5 = vector.shape_cast %4 : vector<8xf32> to vector<8x1xf32>
    %c0_3 = arith.constant 0 : index
    %c0_4 = arith.constant 0 : index
    %6 = memref.load %arg3[%c0_3, %c0_4] : memref<1x1xf32, #tpu.memory_space<smem>>
    %7 = vector.broadcast %6 : f32 to vector<8x1xf32>
    %8 = arith.addf %5, %7 : vector<8x1xf32>
    %c0_5 = arith.constant 0 : index
    %c0_6 = arith.constant 0 : index
    %9 = vector.load %arg4[%c0_5, %c0_6] : memref<8x1xf32, #tpu.memory_space<vmem>>, vector<8x1xf32>
    tpu.vector_store %arg4[%c0_5, %c0_6], %8 {strides = array<i32>} : memref<8x1xf32, #tpu.memory_space<vmem>>, vector<8x1xf32>,
    return
  }
  func.func @transform_0(%arg0: i32) -> (i32, i32) {
    %c0_i32 = arith.constant 0 : i32
    %c0_i32_0 = arith.constant 0 : i32
    return %arg0, %c0_i32 : i32, i32
  }
  func.func @transform_1(%arg0: i32) -> (i32, i32) {
    %c0_i32 = arith.constant 0 : i32
    %c0_i32_0 = arith.constant 0 : i32
    %c0_i32_1 = arith.constant 0 : i32
    return %c0_i32, %c0_i32_0 : i32, i32
  }
  func.func @transform_2(%arg0: i32) -> (i32, i32) {
    %c0_i32 = arith.constant 0 : i32
    %c0_i32_0 = arith.constant 0 : i32
    %c0_i32_1 = arith.constant 0 : i32
    return %c0_i32, %c0_i32_0 : i32, i32
  }
  func.func @transform_3(%arg0: i32) -> (i32, i32) {
    %c0_i32 = arith.constant 0 : i32
    %c0_i32_0 = arith.constant 0 : i32
    return %arg0, %c0_i32 : i32, i32
  }
}

</mosaic_0001>

<bundles_post_ra>
// kernel: tpu_custom_call.1
= control target key start
LH: loop header
LB: loop body
LE: loop exit
PB: predicated region body
PF: predicated region fallthrough
CT: control target
= control target key end

     0   :  { %9 = vsyncpa [#allocation4], 0  ;;  %s99_s12 = smov [#allocation3]   ;;  %s141_s0 = inlined_call_operand.hbm [shape: f32[8,400], index: 0, kind: input, shape index: {}]   ;;  %s142_s1 = inlined_call_operand.vmem [shape: f32[1,400], index: 1, kind: input, shape index: {}]   ;;  %s143_s2 = inlined_call_operand.<no memory space> [shape: f32[1,1], index: 2, kind: input, shape index: {}]   ;;  %s144_s3 = inlined_call_operand.vmem [shape: f32[8,1], index: 3, kind: output, shape index: {}]  }
   0x1   :  { %s16_s13 = sshll.u32 %s99_s12, 4  ;;  %s75_s16 = scalar_lea.hbm %s141_s0, 512  ;;  %s17_s13 = int_to_ptr.vmem [resolvable:$true] %s16_s13 }
   0x2   :  { %p76_p0 = scmp.ne.s32.totalorder %s141_s0, %s75_s16  ;;  %p79_p1 = scmp.lt.u32.totalorder %s75_s16, %s141_s0 }
   0x4   :  { %p81_p2 = pnand %p79_p1, %p76_p0 }
   0x6   :  { %84 = shalt.err (!%p81_p2)
}
   0x7   :  { %s85_s21 = scalar_lea.vmem %s17_s13, 512  ;;  %p90_p4 = scmp.lt.s32.totalorder %s17_s13, %s17_s13 }
   0x8   :  { %p86_p3 = scmp.ne.s32.totalorder %s17_s13, %s85_s21  ;;  %p91_p5 = scmp.lt.s32.totalorder %s85_s21, %s85_s21 }
   0xa   :  { %p92_p6 = por %p91_p5, %p90_p4 }
   0xc   :  { %p93_p7 = pnand %p92_p6, %p86_p3 }
   0xe   :  { %96 = shalt.err (!%p93_p7)
}
   0xf   :  { %19 = dma.hbm_to_vmem [thread:$0]  %s141_s0, 512, %s17_s13, [#allocation4]  }
  0x10   :  { %97 = dma.done.wait [#allocation4], 512  }
  0x11   :  { %98 = vsyncadd [#allocation4], 4294966784  ;;  %v33_v0 = vlaneseq  ;;  %v27_v6 = vld [vmem:[#allocation3] sm:$0xff]  ;;  %v28_v7 = vld [vmem:[#allocation3 + $0x8] sm:$0xff]  ;;  %vm59_vm0 = vcmask 130048   ;;  %v65_v23 = vstv %s143_s2  ;;  %vm67_vm1 = vcmask 7168  }
  0x12   :  { %v29_v8 = vld [vmem:[#allocation3 + $0x10] sm:$0xff]  ;;  %v30_v9 = vld [vmem:[#allocation3 + $0x18] sm:$0xff]  ;;  %v31_v10 = vld [vmem:[%s142_s1] sm:$0xf] }
  0x13   :  { %v34_v1 = vshrl.u32 %v33_v0, 7 }
  0x15   :  { %v35_v2 = vsub.s32 0, %v34_v1  ;;  %v39_v3 = vsub.s32 1, %v34_v1  ;;  %v43_v4 = vsub.s32 2, %v34_v1  ;;  %v47_v5 = vsub.s32 3, %v34_v1 }
  0x17   :  { %v36_v11 = vrot.slane %v31_v10, %v35_v2  ;;  %v40_v12 = vrot.slane %v31_v10, %v39_v3  ;;  %v44_v13 = vrot.slane %v31_v10, %v43_v4  ;;  %v48_v14 = vrot.slane %v31_v10, %v47_v5 }
  0x19   :  { %v53_v15 = vmul.f32 %v36_v11, %v27_v6  ;;  %v54_v16 = vmul.f32 %v40_v12, %v28_v7  ;;  %v55_v17 = vmul.f32 %v44_v13, %v29_v8  ;;  %v56_v18 = vmul.f32 %v48_v14, %v30_v9 }
  0x1b   :  { %v57_v19 = vadd.f32 %v54_v16, %v53_v15  ;;  %v60_v20 = vsel %vm59_vm0, %v56_v18, 0.0 }
  0x1d   :  { %v58_v21 = vadd.f32 %v57_v19, %v55_v17 }
  0x1f   :  { %v61_v22 = vadd.f32 %v60_v20, %v58_v21 }
  0x21   :  { %62 = vadd.xlane.f32.xlu0 %v61_v22 }
  0xae   :  { %v63_v24 = vpop.xlane.xlu0 %62 }
  0xaf   :  { %v66_v25 = vadd.f32 %v65_v23, %v63_v24 }
  0xb1   :  { %68 = vst.msk [vmem:[%s144_s3] sm:$0xff] %vm67_vm1, %v66_v25 }
  0xb2   :  { %73 = vsyncpa [#allocation4], 1 }

</bundles_post_ra>
